<compile_context>
chip_gen: v6e
topology: v6e:2x2x1
jax: 0.10.0
libtpu: 0.0.40
codegen_flags: <defaults>
</compile_context>

<pallas_src>
import jax
import jax.numpy as jnp
from jax.experimental import pallas as pl
from jax.experimental.pallas import tpu as pltpu


def _fnet_fourier_kernel(x_ref, cs_ref, ss_ref, cd_ref, sd_ref, o_ref):
    # x_ref : (S, D)   one batch element (batch dim squeezed away)
    # cs_ref/ss_ref : (TS, S) row tile of the sequence DFT matrices
    # cd_ref/sd_ref : (D, D)  hidden DFT matrices (VMEM-resident)
    # o_ref : (TS, D)  output row tile
    x = x_ref[...]
    # Sequence mixing first (tiled rows), then hidden mixing:
    #   out_tile = (C_S_tile @ X) @ C_D  -  (S_S_tile @ X) @ S_D
    tc = jnp.dot(cs_ref[...], x, preferred_element_type=jnp.float32)    # (TS, D)
    ts = jnp.dot(ss_ref[...], x, preferred_element_type=jnp.float32)    # (TS, D)
    yc = jnp.dot(tc, cd_ref[...], preferred_element_type=jnp.float32)   # (TS, D)
    ys = jnp.dot(ts, sd_ref[...], preferred_element_type=jnp.float32)   # (TS, D)
    o_ref[...] = (yc - ys).astype(o_ref.dtype)


def _dft_matrices(n, dtype=jnp.float32):
    # C[k, m] = cos(2*pi*k*m/n), S[k, m] = sin(2*pi*k*m/n); both symmetric.
    k = jnp.arange(n)
    prod = (k[:, None] * k[None, :]) % n            # keep angles in [0, 2*pi)
    ang = (2.0 * jnp.pi / n) * prod.astype(dtype)
    return jnp.cos(ang), jnp.sin(ang)


def _pick_seq_tile(s):
    # Full extent for short sequences; otherwise a (8,128)-friendly divisor so
    # the (TS, S) seq-DFT tiles + intermediates fit comfortably in VMEM.
    if s <= 512:
        return s
    for ts in (512, 256, 128, 64, 32, 16, 8):
        if s % ts == 0:
            return ts
    return s


def fnet_basic_fourier_transform(x):
    """x: (batch, seq, hidden) real array. Returns Re(fftn(x, axes=(1, 2)))."""
    B, S, D = x.shape
    xf = x.astype(jnp.float32)
    cs, ss = _dft_matrices(S)
    cd, sd = _dft_matrices(D)

    TS = _pick_seq_tile(S)
    n_s_tiles = S // TS

    # 4 matmuls per batch element: 2x (S,S)@(S,D) + 2x (S,D)@(D,D).
    macs = B * (2 * S * S * D + 2 * S * D * D)
    cost = pl.CostEstimate(
        flops=2 * macs,
        transcendentals=0,
        bytes_accessed=(2 * B * S * D + 2 * (S * S + D * D)) * 4,
    )

    out = pl.pallas_call(
        _fnet_fourier_kernel,
        out_shape=jax.ShapeDtypeStruct((B, S, D), x.dtype),
        grid=(B, n_s_tiles),
        in_specs=[
            # One batch element; constant over the seq-tile axis -> DMA'd once
            # per batch element and reused for all row tiles.
            pl.BlockSpec((None, S, D), lambda b, s: (b, 0, 0)),
            # Sequence DFT matrices: streamed row tiles.
            pl.BlockSpec((TS, S), lambda b, s: (s, 0)),
            pl.BlockSpec((TS, S), lambda b, s: (s, 0)),
            # Hidden DFT matrices: constant index_map -> VMEM-resident.
            pl.BlockSpec((D, D), lambda b, s: (0, 0)),
            pl.BlockSpec((D, D), lambda b, s: (0, 0)),
        ],
        out_specs=pl.BlockSpec((None, TS, D), lambda b, s: (b, s, 0)),
        compiler_params=pltpu.CompilerParams(
            dimension_semantics=("parallel", "parallel"),
            vmem_limit_bytes=64 * 1024 * 1024,
        ),
        cost_estimate=cost,
    )(xf, cs, ss, cd, sd)
    return out
    # TODO(synk): for very large hidden sizes, additionally tile the hidden
    # dim (caching C_S_tile @ X in scratch) so cd/sd need not be fully resident.


if __name__ == "__main__":
    key = jax.random.PRNGKey(0)
    batch, seq, hidden = 2, 8, 32
    x = jax.random.normal(key, (batch, seq, hidden), dtype=jnp.float32)

    out = fnet_basic_fourier_transform(x)
    out = jax.block_until_ready(out)

    # Reference: real part of the 2-D FFT over (seq, hidden), as in the module.
    ref = jnp.fft.fftn(x, axes=(1, 2)).real
    assert out.shape == ref.shape
    assert jnp.allclose(out, ref, atol=1e-3, rtol=1e-3), float(
        jnp.max(jnp.abs(out - ref))
    )

    print("KERNEL_OK")
</pallas_src>

<mosaic_0001>
module attributes {stable_mosaic.version = 11 : i64} {
  func.func @_fnet_fourier_kernel(%arg0: i32, %arg1: i32, %arg2: memref<1x8x32xf32, #tpu.memory_space<vmem>>, %arg3: memref<8x8xf32, #tpu.memory_space<vmem>>, %arg4: memref<8x8xf32, #tpu.memory_space<vmem>>, %arg5: memref<32x32xf32, #tpu.memory_space<vmem>>, %arg6: memref<32x32xf32, #tpu.memory_space<vmem>>, %arg7: memref<1x8x32xf32, #tpu.memory_space<vmem>>) attributes {dimension_semantics = [#tpu.dimension_semantics<parallel>, #tpu.dimension_semantics<parallel>], iteration_bounds = array<i64: 2, 1>, scalar_prefetch = 0 : i64, scratch_operands = 0 : i64, tpu.core_type = #tpu.core_type<tc>, window_params = [{transform_indices = @transform_0, window_bounds = array<i64: 1, 8, 32>}, {transform_indices = @transform_1, window_bounds = array<i64: 8, 8>}, {transform_indices = @transform_2, window_bounds = array<i64: 8, 8>}, {pipeline_mode = #tpu.pipeline_mode<synchronous>, transform_indices = @transform_3, window_bounds = array<i64: 32, 32>}, {pipeline_mode = #tpu.pipeline_mode<synchronous>, transform_indices = @transform_4, window_bounds = array<i64: 32, 32>}, {transform_indices = @transform_5, window_bounds = array<i64: 1, 8, 32>}]} {
    %c0 = arith.constant 0 : index
    %c0_0 = arith.constant 0 : index
    %c0_1 = arith.constant 0 : index
    %0 = vector.load %arg2[%c0, %c0_0, %c0_1] : memref<1x8x32xf32, #tpu.memory_space<vmem>>, vector<1x8x32xf32>
    %1 = vector.shape_cast %0 : vector<1x8x32xf32> to vector<8x32xf32>
    %c0_2 = arith.constant 0 : index
    %c0_3 = arith.constant 0 : index
    %2 = vector.load %arg3[%c0_2, %c0_3] : memref<8x8xf32, #tpu.memory_space<vmem>>, vector<8x8xf32>
    %cst = arith.constant dense<0.000000e+00> : vector<8x32xf32>
    %3 = tpu.matmul %2, %1, %cst {dimension_numbers = #tpu.dot_dimension_numbers<[1], [0], [0], [1], [0, 0, 1, 1], [], []>} : vector<8x8xf32>, vector<8x32xf32>, vector<8x32xf32> -> vector<8x32xf32>
    %c0_4 = arith.constant 0 : index
    %c0_5 = arith.constant 0 : index
    %4 = vector.load %arg4[%c0_4, %c0_5] : memref<8x8xf32, #tpu.memory_space<vmem>>, vector<8x8xf32>
    %cst_6 = arith.constant dense<0.000000e+00> : vector<8x32xf32>
    %5 = tpu.matmul %4, %1, %cst_6 {dimension_numbers = #tpu.dot_dimension_numbers<[1], [0], [0], [1], [0, 0, 1, 1], [], []>} : vector<8x8xf32>, vector<8x32xf32>, vector<8x32xf32> -> vector<8x32xf32>
    %c0_7 = arith.constant 0 : index
    %c0_8 = arith.constant 0 : index
    %6 = vector.load %arg5[%c0_7, %c0_8] : memref<32x32xf32, #tpu.memory_space<vmem>>, vector<32x32xf32>
    %cst_9 = arith.constant dense<0.000000e+00> : vector<8x32xf32>
    %7 = tpu.matmul %3, %6, %cst_9 {dimension_numbers = #tpu.dot_dimension_numbers<[1], [0], [0], [1], [0, 0, 1, 1], [], []>} : vector<8x32xf32>, vector<32x32xf32>, vector<8x32xf32> -> vector<8x32xf32>
    %c0_10 = arith.constant 0 : index
    %c0_11 = arith.constant 0 : index
    %8 = vector.load %arg6[%c0_10, %c0_11] : memref<32x32xf32, #tpu.memory_space<vmem>>, vector<32x32xf32>
    %cst_12 = arith.constant dense<0.000000e+00> : vector<8x32xf32>
    %9 = tpu.matmul %5, %8, %cst_12 {dimension_numbers = #tpu.dot_dimension_numbers<[1], [0], [0], [1], [0, 0, 1, 1], [], []>} : vector<8x32xf32>, vector<32x32xf32>, vector<8x32xf32> -> vector<8x32xf32>
    %10 = arith.subf %7, %9 : vector<8x32xf32>
    %c0_13 = arith.constant 0 : index
    %c0_14 = arith.constant 0 : index
    %c0_15 = arith.constant 0 : index
    %11 = vector.load %arg7[%c0_13, %c0_14, %c0_15] : memref<1x8x32xf32, #tpu.memory_space<vmem>>, vector<1x8x32xf32>
    %12 = vector.shape_cast %11 : vector<1x8x32xf32> to vector<8x32xf32>
    %13 = vector.shape_cast %10 : vector<8x32xf32> to vector<1x8x32xf32>
    tpu.vector_store %arg7[%c0_13, %c0_14, %c0_15], %13 {strides = array<i32>} : memref<1x8x32xf32, #tpu.memory_space<vmem>>, vector<1x8x32xf32>,
    return
  }
  func.func @transform_0(%arg0: i32, %arg1: i32) -> (i32, i32, i32) {
    %c0_i32 = arith.constant 0 : i32
    %c0_i32_0 = arith.constant 0 : i32
    %c0_i32_1 = arith.constant 0 : i32
    return %arg0, %c0_i32, %c0_i32_0 : i32, i32, i32
  }
  func.func @transform_1(%arg0: i32, %arg1: i32) -> (i32, i32) {
    %c0_i32 = arith.constant 0 : i32
    %c0_i32_0 = arith.constant 0 : i32
    return %arg1, %c0_i32 : i32, i32
  }
  func.func @transform_2(%arg0: i32, %arg1: i32) -> (i32, i32) {
    %c0_i32 = arith.constant 0 : i32
    %c0_i32_0 = arith.constant 0 : i32
    return %arg1, %c0_i32 : i32, i32
  }
  func.func @transform_3(%arg0: i32, %arg1: i32) -> (i32, i32) {
    %c0_i32 = arith.constant 0 : i32
    %c0_i32_0 = arith.constant 0 : i32
    %c0_i32_1 = arith.constant 0 : i32
    return %c0_i32, %c0_i32_0 : i32, i32
  }
  func.func @transform_4(%arg0: i32, %arg1: i32) -> (i32, i32) {
    %c0_i32 = arith.constant 0 : i32
    %c0_i32_0 = arith.constant 0 : i32
    %c0_i32_1 = arith.constant 0 : i32
    return %c0_i32, %c0_i32_0 : i32, i32
  }
  func.func @transform_5(%arg0: i32, %arg1: i32) -> (i32, i32, i32) {
    %c0_i32 = arith.constant 0 : i32
    %c0_i32_0 = arith.constant 0 : i32
    return %arg0, %arg1, %c0_i32 : i32, i32, i32
  }
}

</mosaic_0001>

<bundles_post_ra>
// kernel: tpu_custom_call.1
= control target key start
LH: loop header
LB: loop body
LE: loop exit
PB: predicated region body
PF: predicated region fallthrough
CT: control target
= control target key end

     0   :  { %s1424_s0 = inlined_call_operand.hbm [shape: f32[2,8,32], index: 0, kind: input, shape index: {}]   ;;  %s1425_s1 = inlined_call_operand.hbm [shape: f32[8,8], index: 1, kind: input, shape index: {}]   ;;  %s1426_s2 = inlined_call_operand.hbm [shape: f32[8,8], index: 2, kind: input, shape index: {}]   ;;  %s1427_s3 = inlined_call_operand.hbm [shape: f32[32,32], index: 3, kind: input, shape index: {}]   ;;  %s1428_s4 = inlined_call_operand.hbm [shape: f32[32,32], index: 4, kind: input, shape index: {}]   ;;  %s1429_s5 = inlined_call_operand.hbm [shape: f32[2,8,32], index: 5, kind: output, shape index: {}]  }
   0x1   :  { %1433 = sst [smem:[#allocation16_spill]] %s1425_s1 }
   0x2   :  { %1434 = sst [smem:[#allocation17_spill]] %s1426_s2 }
   0x3   :  { %10 = vsyncpa [#allocation3], 0 }
   0x4   :  { %12 = vsyncpa [#allocation3 + $0x1], 0 }
   0x5   :  { %13 = vsyncpa [#allocation6], 0 }
   0x6   :  { %14 = vsyncpa [#allocation9], 0 }
   0x7   :  { %15 = vsyncpa [#allocation4], 0 }
   0x8   :  { %17 = vsyncpa [#allocation4 + $0x1], 0  ;;  %s1205_s18 = smov 0   ;;  %s1207_s19 = smov 0  }
   0x9   :  { %s1209_s20 = smov 0   ;;  %s1211_s21 = smov 0  }
   0xa   :  { %s1213_s22 = smov 0   ;;  %s1215_s23 = smov 0  }
   0xb LB: > { %s765_s24 = sadd.s32 4294967295, %s1163_s23   ;;  %p767_p0 = scmp.ge.s32.totalorder %s1163_s23, 1  ;;  %s1163_s23 = sphi %s1215_s23, %s23_s23   ;;  %s1159_s22 = sphi %s1213_s22, %s1453_s22   ;;  %s1155_s21 = sphi %s1211_s21, %s1452_s21   ;;  %s1151_s20 = sphi %s1209_s20, %s1451_s20   ;;  %s1147_s19 = sphi %s1207_s19, %s1450_s19   ;;  %s1143_s18 = sphi %s1205_s18, %s1449_s18  }
   0xc   : > { %p1239_p1 = scmp.eq.s32.totalorder %s765_s24, 0  ;;  %p188_p2 = scmp.lt.s32.totalorder %s1163_s23, 3 }
   0xd   : > { %s1165_s27 = smov [#allocation5]   ;;  %s1166_s29 = smov [#allocation8]  }
   0xe   : > { %s1435_s25 = scalar_select %p1239_p1, 1, 0 }
   0xf   : > { %p1244_p3 = pnand %p767_p0, %p188_p2  ;;  %s203_s28 = sshll.u32 %s1165_s27, 4  ;;  %s204_s28 = int_to_ptr.vmem [resolvable:$true] %s203_s28 }
  0x10   : > { %s226_s30 = sshll.u32 %s1166_s29, 4  ;;  %s1167_s7 = smov [#allocation7]   ;;  %s227_s30 = int_to_ptr.vmem [resolvable:$true] %s226_s30 }
  0x11   : > { %s1436_s26 = scalar_select %p1244_p3, 1, 0 }
  0x12   : > { %p856_p5 = pneg %p1244_p3  ;;  %s216_s8 = sshll.u32 %s1167_s7, 4  ;;  %s217_s8 = int_to_ptr.vmem [resolvable:$true] %s216_s8 }
  0x13   : > { %s954_s9 = scalar_lea.vmem %s204_s28, 128  ;;  %p962_p11 = scmp.lt.s32.totalorder %s204_s28, %s204_s28 }
  0x14   : > { %p1253_p6 = pnand %p856_p5, %p1239_p1  ;;  %p955_p8 = scmp.ne.s32.totalorder %s204_s28, %s954_s9 }
  0x15   : > { %p963_p12 = scmp.lt.s32.totalorder %s954_s9, %s954_s9 }
  0x16   : > { %p945_p7 = pneg %p1253_p6 }
  0x17   : > { %p964_p13 = por %p963_p12, %p962_p11 }
  0x18   : > { %p957_p9 = pnand %p955_p8, %p945_p7 }
  0x1a   : > { %p958_p10 = pneg %p957_p9 }
  0x1c   : > { %p965_p0 = pnand %p964_p13, %p958_p10 }
  0x1e   : > { %968 = shalt.err (!%p965_p0)
}
  0x1f   : > { %s1438_s1 = sld [smem:[#allocation16_spill]]  ;;  %s980_s12 = scalar_lea.vmem %s227_s30, 512 }
  0x20   : > { %p981_p2 = scmp.ne.s32.totalorder %s227_s30, %s980_s12  ;;  %p988_p8 = scmp.lt.s32.totalorder %s227_s30, %s227_s30 }
  0x21   : > { %p989_p9 = scmp.lt.s32.totalorder %s980_s12, %s980_s12 }
  0x22   : > { %p983_p5 = pnand %p981_p2, %p945_p7 }
  0x23   : > { %p990_p3 = por %p989_p9, %p988_p8 }
  0x24   : > { %p984_p4 = pneg %p983_p5 }
  0x25   : > { %859 = dma.hbm_to_vmem [thread:$0]  (!%p1253_p6), %s1438_s1, 128, %s204_s28, [#allocation6]  }
  0x26   : > { %p991_p1 = pnand %p990_p3, %p984_p4 }
  0x28   : > { %994 = shalt.err (!%p991_p1)
}
  0x29   : > { %s1168_s13 = smov 128   ;;  %s1169_s14 = smov 8  }
  0x2a   : > { %865 = dma.hbm_to_vmem [thread:$0]  (!%p1253_p6), %s1427_s3, 512, %s227_s30, [#allocation9], %s1168_s13, %s1168_s13, %s1169_s14  }
  0x2b   : > { %s1006_s17 = scalar_lea.vmem %s217_s8, 128  ;;  %p1014_p13 = scmp.lt.s32.totalorder %s217_s8, %s217_s8 }
  0x2c   : > { %p1007_p10 = scmp.ne.s32.totalorder %s217_s8, %s1006_s17  ;;  %p1015_p0 = scmp.lt.s32.totalorder %s1006_s17, %s1006_s17 }
  0x2e   : > { %p1009_p11 = pnand %p1007_p10, %p945_p7  ;;  %p1016_p3 = por %p1015_p0, %p1014_p13 }
  0x30   : > { %p1010_p12 = pneg %p1009_p11 }
  0x32   : > { %p1017_p1 = pnand %p1016_p3, %p1010_p12 }
  0x34   : > { %1020 = shalt.err (!%p1017_p1)
}
  0x35   : > { %s1439_s2 = sld [smem:[#allocation17_spill]]  ;;  %s1170_s29 = smov [#allocation10]  }
  0x36   : > { %s239_s30 = sshll.u32 %s1170_s29, 4  ;;  %s240_s30 = int_to_ptr.vmem [resolvable:$true] %s239_s30 }
  0x37   : > { %s1032_s7 = scalar_lea.vmem %s240_s30, 512  ;;  %p1040_p8 = scmp.lt.s32.totalorder %s240_s30, %s240_s30 }
  0x38   : > { %p1033_p4 = scmp.ne.s32.totalorder %s240_s30, %s1032_s7  ;;  %p1041_p9 = scmp.lt.s32.totalorder %s1032_s7, %s1032_s7 }
  0x3a   : > { %p1035_p2 = pnand %p1033_p4, %p945_p7  ;;  %p1042_p10 = por %p1041_p9, %p1040_p8 }
  0x3b   : > { %862 = dma.hbm_to_vmem [thread:$0]  (!%p1253_p6), %s1439_s2, 128, %s217_s8, [#allocation6]  }
  0x3c   : > { %p1036_p5 = pneg %p1035_p2 }
  0x3e   : > { %p1043_p11 = pnand %p1042_p10, %p1036_p5 }
  0x40   : > { %1046 = shalt.err (!%p1043_p11)
}
  0x41   : > { %868 = dma.hbm_to_vmem [thread:$0]  (!%p1253_p6), %s1428_s4, 512, %s240_s30, [#allocation9], %s1168_s13, %s1168_s13, %s1169_s14  }
  0x42   : > { %s766_s8 = sadd.s32 4294967294, %s1163_s23   ;;  %s35_s11 = sadd.s32 1, %s1159_s22 }
  0x43   : > { %p37_p7 = scmp.ge.s32.totalorder %s35_s11, 2  ;;  %s42_s6 = sadd.s32 1, %s1151_s20 }
  0x44   : > { %p49_p12 = scmp.ne.s32.totalorder %s1151_s20, %s1147_s19  ;;  %p50_p13 = scmp.eq.s32.totalorder %s1163_s23, 0 }
  0x45   : > { %s1455_s11 = smov (%p37_p7, %s35_s11), 0  ;;  %p55_p3 = scmp.ne.s32.totalorder %s1147_s19, %s1143_s18 }
  0x46   : > { %p1299_p0 = por %p50_p13, %p49_p12  ;;  %s39_s13 = ssub.s32 %s1159_s22, %s1455_s11 }
  0x47   : > { %p175_p6 = scmp.eq.s32.totalorder %s765_s24, 1  ;;  %p40_p1 = scmp.eq.s32.totalorder %s39_s13, 0 }
  0x48   : > { %p1441_p4 = scmp.ne.s32.totalorder %s1435_s25, 0  ;;  %p181_p8 = scmp.eq.s32.totalorder %s766_s8, 1 }
  0x49   : > { %p1315_p5 = por %p175_p6, %p49_p12  ;;  %p881_p10 = scmp.lt.s32.totalorder %s1163_s23, 2 }
  0x4a   : > { %p1311_p2 = por %p1441_p4, %p55_p3  ;;  %p1322_p9 = por %p181_p8, %p55_p3 }
  0x4b   : > { %s1320_s16 = scalar_select %p40_p1, %s1151_s20, %s42_s6  }
  0x4c   : > { %s253_s27 = sand.u32 1, %s1151_s20   ;;  %s774_s24 = sshll.u32 %s1159_s22, 7 }
  0x4d   : > { %s773_s28 = sshll.u32 %s253_s27, 3  ;;  %s262_s7 = scalar_lea.hbm %s1424_s0, %s774_s24 }
  0x4e   : > { %s257_s9 = scalar_lea.vmem [#allocation2], %s773_s28  ;;  %p1334_p11 = pnand %p881_p10, %p1299_p0 }
  0x4f   : > { %s264_s10 = sshll.u32 %s257_s9, 4  ;;  %s254_s8 = scalar_lea.sflag [#allocation3], %s253_s27  ;;  %s265_s10 = int_to_ptr.vmem [resolvable:$true] %s264_s10 }
  0x50   : > { %p1049_p7 = pneg %p1334_p11  ;;  %s1060_s6 = scalar_lea.vmem %s265_s10, 128 }
  0x51   : > { %p1061_p12 = scmp.ne.s32.totalorder %s265_s10, %s1060_s6  ;;  %s1171_s1 = smov [#allocation2]  }
  0x52   : > { %s1065_s2 = sshll.u32 %s1171_s1, 4  ;;  %s1066_s2 = int_to_ptr.vmem [resolvable:$false] %s1065_s2 }
  0x53   : > { %p1063_p13 = pnand %p1061_p12, %p1049_p7  ;;  %s1067_s24 = scalar_lea.vmem %s1066_s2, 256 }
  0x54   : > { %p1068_p6 = scmp.lt.s32.totalorder %s265_s10, %s1066_s2  ;;  %p1069_p1 = scmp.lt.s32.totalorder %s1067_s24, %s1060_s6 }
  0x55   : > { %p1064_p3 = pneg %p1063_p13 }
  0x56   : > { %p1070_p4 = por %p1069_p1, %p1068_p6 }
  0x58   : > { %p1071_p0 = pnand %p1070_p4, %p1064_p3 }
  0x5a   : > { %1074 = shalt.err (!%p1071_p0)
}
  0x5b   : > { %872 = dma.hbm_to_vmem [thread:$0]  (!%p1334_p11), %s262_s7, 128, %s265_s10, %s254_s8  }
  0x5c   : > { %p1446_p8 = scmp.ne.s32.totalorder %s1436_s26, 0 }
  0x5d   : > { %s1345_s12 = sand.u32 (!%p1446_p8), 1, %s1147_s19  }
  0x5e   : > { %273 = sbr.rel (%p1446_p8) target bundleno = 510 (0x1fe), region = 40  ;;  %s776_s1 = sshll.u32 (!%p1446_p8), %s1345_s12, 3 }
  0x5f   : > { %s276_s27 = scalar_lea.sflag (!%p1446_p8), [#allocation3], %s1345_s12  ;;  %s279_s2 = scalar_lea.vmem (!%p1446_p8), [#allocation2], %s776_s1 }
  0x63   : > { %1126 = dma.done.wait (%p1311_p2), %s276_s27, 128  }
  0x64   : > { %1128 = vsyncadd (%p1311_p2), %s276_s27, 4294967168  ;;  %p1447_p10 = scmp.ne.s32.totalorder %s1435_s25, 0 }
  0x66   : > { %1130 = dma.done.wait (%p1447_p10), [#allocation6], 256  }
  0x67   : > { %1132 = vsyncadd (%p1447_p10), [#allocation6], 4294967040 }
  0x68   : > { %1134 = dma.done.wait (%p1447_p10), [#allocation9], 1024  }
  0x69   : > { %1136 = vsyncadd (%p1447_p10), [#allocation9], 4294966272  ;;  %v1172_v0 = vmov 0.0   ;;  %vm1173_vm0 = vmmov 0   ;;  %vm324_vm1 = vcmask 64512   ;;  %v322_v1 = vld [vmem:[%s279_s2] sm:$0xff] }
  0x6a   : > { %804 = vmatprep.subr.mxu0 %v1172_v0  ;;  %809 = vmatprep.subr.mxu1 %v1172_v0  ;;  %v323_v2 = vld [vmem:[#allocation5] sm:$0xff]  ;;  %v398_v3 = vld [vmem:[#allocation7] sm:$0xff]  ;;  %v473_v8 = vld [vmem:[#allocation8 + $0x8] sm:$0xff]  ;;  %vm476_vm2 = vcmask 261120   ;;  %s787_s25 = sshll.u32 %s1155_s21, 7  ;;  %s321_s26 = scalar_lea.vmem [#allocation11], %s776_s1 }
  0x6b   : > { %806 = vmatprep.mubr.msk.f32.mxu0 %vm1173_vm0, %v1172_v0  ;;  %811 = vmatprep.mubr.msk.f32.mxu1 %vm1173_vm0, %v1172_v0  ;;  %v475_v4 = vld [vmem:[#allocation8 + $0x18] sm:$0xff]  ;;  %v474_v6 = vld [vmem:[#allocation8 + $0x10] sm:$0xff]  ;;  %v551_v9 = vld [vmem:[#allocation10 + $0x8] sm:$0xff]  ;;  %s644_s14 = sshll.u32 %s321_s26, 4  ;;  %s1375_s30 = scalar_lea.hbm %s1429_s5, %s787_s25  ;;  %s1377_s14 = int_to_ptr.vmem [resolvable:$true] %s644_s14 }
  0x6c   : > { %805 = vmatpush3.msra.mxu0 %v322_v1  ;;  %810 = vmatpush3.msra.mxu1 %v322_v1  ;;  %v553_v5 = vld [vmem:[#allocation10 + $0x18] sm:$0xff]  ;;  %v552_v7 = vld [vmem:[#allocation10 + $0x10] sm:$0xff]  ;;  %v472_v10 = vld [vmem:[#allocation8] sm:$0xff]  ;;  %s630_s21 = scalar_lea.sflag [#allocation4], %s1345_s12  ;;  %s1075_s7 = scalar_lea.vmem %s1377_s14, 128 }
  0x6d   : > { %807 = vmatmul.mubr.msk.f32.vlgmr.msra.gmra.mxu0 %vm324_vm1, %v323_v2  ;;  %812 = vmatmul.mubr.msk.f32.vlgmr.msra.gmra.mxu1 %vm324_vm1, %v398_v3  ;;  %v550_v11 = vld [vmem:[#allocation10] sm:$0xff]  ;;  %p1076_p2 = scmp.ne.s32.totalorder %s1377_s14, %s1075_s7  ;;  %s1174_s9 = smov [#allocation11]  }
  0x6e   : > { %814 = vmatprep.subr.mxu0 %v1172_v0  ;;  %825 = vmatprep.subr.mxu1 %v1172_v0  ;;  %s1079_s10 = sshll.u32 %s1174_s9, 4  ;;  %s1080_s10 = int_to_ptr.vmem [resolvable:$false] %s1079_s10 }
  0x6f   : > { %815 = vmatpush3.msra.mxu0 %v475_v4  ;;  %826 = vmatpush3.msra.mxu1 %v553_v5  ;;  %p1077_p11 = pnand %p1076_p2, %p1315_p5  ;;  %s1081_s13 = scalar_lea.vmem %s1080_s10, 256 }
  0x70   : > { %816 = vmatprep.subr.mxu0 %v1172_v0  ;;  %827 = vmatprep.subr.mxu1 %v1172_v0  ;;  %p1082_p12 = scmp.lt.s32.totalorder %s1377_s14, %s1080_s10  ;;  %p1083_p13 = scmp.lt.s32.totalorder %s1081_s13, %s1075_s7 }
  0x71   : > { %817 = vmatpush3.msra.mxu0 %v474_v6  ;;  %828 = vmatpush3.msra.mxu1 %v552_v7  ;;  %p1078_p7 = pneg %p1077_p11 }
  0x72   : > { %818 = vmatprep.subr.mxu0 %v1172_v0  ;;  %829 = vmatprep.subr.mxu1 %v1172_v0  ;;  %p1084_p3 = por %p1083_p13, %p1082_p12 }
  0x73   : > { %819 = vmatpush3.msra.mxu0 %v473_v8  ;;  %830 = vmatpush3.msra.mxu1 %v551_v9 }
  0x74   : > { %820 = vmatprep.subr.mxu0 %v1172_v0  ;;  %831 = vmatprep.subr.mxu1 %v1172_v0  ;;  %p1085_p6 = pnand %p1084_p3, %p1078_p7 }
  0x75   : > { %822 = vmatprep.mubr.msk.f32.mxu0 %vm1173_vm0, %v1172_v0  ;;  %833 = vmatprep.mubr.msk.f32.mxu1 %vm1173_vm0, %v1172_v0 }
  0x76   : > { %821 = vmatpush3.msra.mxu0 %v472_v10  ;;  %832 = vmatpush3.msra.mxu1 %v550_v11 }
 0x12d   : > { %v394_v12 = vpop.f32.mrf.mxu0  ;;  %v468_v13 = vpop.f32.mrf.mxu1 }
 0x12e   : > { %823 = vmatmul.mubr.msk.f32.vlgmr.msra.gmra.mxu0 %vm476_vm2, %v394_v12  ;;  %834 = vmatmul.mubr.msk.f32.vlgmr.msra.gmra.mxu1 %vm476_vm2, %v468_v13 }
 0x12f   : > { %v808_v14 = vpop.f32.mrf.mxu0  ;;  %v813_v15 = vpop.f32.mrf.mxu1 }
 0x1ee   : > { %v546_v16 = vpop.f32.mrf.mxu0  ;;  %v623_v17 = vpop.f32.mrf.mxu1 }
 0x1ef   : > { %v627_v18 = vsub.f32 %v546_v16, %v623_v17 }
 0x1f0   : > { %v824_v19 = vpop.f32.mrf.mxu0  ;;  %v835_v20 = vpop.f32.mrf.mxu1 }
 0x1f1   : > { %628 = vst.msk [vmem:[%s321_s26] sm:$0xff] %vm476_vm2, %v627_v18 }
 0x1f2   : > { %1088 = shalt.err (!%p1085_p6)
}
 0x1f3   : > { %s1089_s8 = scalar_lea.hbm %s1375_s30, 128  ;;  %s1093_s12 = scalar_lea.hbm %s1429_s5, 256 }
 0x1f4   : > { %p1090_p1 = scmp.ne.s32.totalorder %s1375_s30, %s1089_s8  ;;  %p1094_p8 = scmp.lt.s32.totalorder %s1375_s30, %s1429_s5 }
 0x1f5   : > { %p1095_p10 = scmp.lt.s32.totalorder %s1093_s12, %s1089_s8 }
 0x1f6   : > { %p1091_p4 = pnand %p1090_p1, %p1315_p5 }
 0x1f7   : > { %p1096_p2 = por %p1095_p10, %p1094_p8 }
 0x1f8   : > { %p1092_p0 = pneg %p1091_p4 }
 0x1fa   : > { %p1097_p11 = pnand %p1096_p2, %p1092_p0 }
 0x1fc   : > { %1100 = shalt.err (!%p1097_p11)
}
 0x1fd   : > { %854 = dma.vmem_to_hbm [thread:$0]  (%p1315_p5), %s1377_s14, 128, %s1375_s30, %s630_s21  }
 0x1fe PF: > { %s656_s2 = sand.u32 1, %s1143_s18   ;;  %p1448_p7 = scmp.ge.s32.totalorder %s1163_s23, 2 }
 0x1ff   : > { %s657_s25 = scalar_lea.sflag [#allocation4], %s656_s2 }
 0x200   : > { %p874_p12 = pnand %p1448_p7, %p1322_p9 }
 0x202   : > { %p875_p13 = pneg %p874_p12 }
 0x204   : > { %1138 = dma.done.wait (%p875_p13), %s657_s25, 128  }
 0x205   : > { %1140 = vsyncadd (%p875_p13), %s657_s25, 4294967168  ;;  %s23_s23 = sadd.s32 1, %s1163_s23   ;;  %s1449_s18 = smov %s1147_s19 }
 0x206   : > { %p20_p3 = scmp.ge.s32.totalorder %s23_s23, 4   ;;  %s1450_s19 = smov %s1151_s20 }
 0x207   : > { %s1451_s20 = smov %s1320_s16  ;;  %s1452_s21 = smov %s1159_s22 }
 0x208   : > { %s1453_s22 = smov %s1455_s11  ;;  %22 = sbr.rel (!%p20_p3) target bundleno = 11 (0xb), region = 103 }
 0x20d   :  { %662 = vsyncpa [#allocation3], 1 }
 0x20e   :  { %664 = vsyncpa [#allocation3 + $0x1], 1 }
 0x20f   :  { %665 = vsyncpa [#allocation6], 1 }
 0x210   :  { %666 = vsyncpa [#allocation9], 1 }
 0x211   :  { %667 = vsyncpa [#allocation4], 1 }
 0x212   :  { %669 = vsyncpa [#allocation4 + $0x1], 1 }

</bundles_post_ra>
